<compile_context>
chip_gen: v6e
topology: v6e:2x2x1
jax: 0.10.0
libtpu: 0.0.40
codegen_flags: <defaults>
</compile_context>

<pallas_src>
import functools

import jax
import jax.numpy as jnp
import numpy as np
from jax.experimental import pallas as pl
from jax.experimental.pallas import tpu as pltpu

_LANES = 128
_MASK_SUBLANES = 32      # int8 min sublane tile -> keep tile_r a multiple of 32
_MAX_TILE_R = 2048       # 2048 rows x 128 lanes = 262144 boxes per coord per tile


def _giou_partial_kernel(scal_ref, preds_ref, mask_ref, out_ref, *, eps):
    # scal_ref : (7,) f32 SMEM  -- [bx1, by1, bx2, by2, bw, bh, area_b + eps]
    # preds_ref: (4, TILE_R, 128) f32 -- coordinate-major predictions
    # mask_ref : (TILE_R, 128) int8   -- 1 keep / 0 ignored-or-padding
    # out_ref  : (1, 1, 128) f32      -- per-lane partial sums for this tile
    bx1 = scal_ref[0]
    by1 = scal_ref[1]
    bx2 = scal_ref[2]
    by2 = scal_ref[3]
    bw = scal_ref[4]            # bx2 - bx1 + 1
    bh = scal_ref[5]            # by2 - by1 + 1
    area_b_eps = scal_ref[6]    # (bw * bh) + eps

    px1 = preds_ref[0]          # (TILE_R, 128), fully dense vregs
    py1 = preds_ref[1]
    px2 = preds_ref[2]
    py2 = preds_ref[3]

    # Intersection extents (raw, pre-clamp) and clamped widths/heights.
    iwr = jnp.minimum(px2, bx2) - jnp.maximum(px1, bx1) + 1.0
    ihr = jnp.minimum(py2, by2) - jnp.maximum(py1, by1) + 1.0
    iw = jnp.maximum(iwr, 0.0)
    ih = jnp.maximum(ihr, 0.0)
    inters = iw * ih

    # Prediction box area.
    w = px2 - px1 + 1.0
    h = py2 - py1 + 1.0
    area_p = w * h

    # Enclosing box via max(a,b) + min(a,b) == a + b:
    #   ew_raw = (ex2 - ex1 + 1) = w + bw - iw_raw   (same for height)
    ew = jnp.maximum((w - iwr) + bw, 0.0)
    eh = jnp.maximum((h - ihr) + bh, 0.0)
    enclose = ew * eh + eps

    uni = area_p + area_b_eps - inters   # area_b + eps pre-folded

    # Reciprocals on the EUP (free bundle slot) + one Newton step for accuracy.
    r_uni = pl.reciprocal(uni, approx=True)
    r_uni = r_uni * (2.0 - uni * r_uni)
    r_enc = pl.reciprocal(enclose, approx=True)
    r_enc = r_enc * (2.0 - enclose * r_enc)

    # loss = 1 - giou = 2 - inters/uni - uni/enclose
    loss = (2.0 - inters * r_uni) - uni * r_enc

    masked = jnp.where(mask_ref[...] != 0, loss, 0.0)     # (TILE_R, 128)

    # Sublane-only reduce -> lane-dense (1, 128) partial for this tile.
    out_ref[0] = jnp.sum(masked, axis=0, keepdims=True)


def _choose_tiling(n):
    """Pick (tile_r, num_tiles) over r_needed = cdiv(n, 128) sublane rows."""
    r_needed = max(1, pl.cdiv(n, _LANES))
    # >= 2 tiles when there is enough data (v7x: 2 TensorCores share the
    # "parallel" grid axis); cap the tile so the double-buffered footprint
    # (~8.5 MiB at tile_r=2048) stays under v5e's 16 MiB default scoped VMEM.
    min_tiles = 2 if r_needed >= 2 * _MASK_SUBLANES else 1
    target_tiles = max(min_tiles, pl.cdiv(r_needed, _MAX_TILE_R))
    tile_r = pl.cdiv(pl.cdiv(r_needed, target_tiles), _MASK_SUBLANES) * _MASK_SUBLANES
    tile_r = min(tile_r, _MAX_TILE_R)
    num_tiles = pl.cdiv(r_needed, tile_r)
    return tile_r, num_tiles


def giou_loss(preds, bbox, eps=1e-7, reduction="mean"):
    """Pallas implementation of the PyTorch giou_loss.forward.

    preds: (N, 4) float32, bbox: (N, 4) float32.
    Rows of bbox equal to [1,1,1,1] are filtered out (ignored); only the first
    non-ignored bbox row participates (matching the reference's dim=1 cat).
    Returns a scalar float32 array holding the reduced loss.
    """
    if reduction not in ("mean", "sum"):
        raise NotImplementedError(reduction)

    preds = jnp.asarray(preds, jnp.float32)
    bbox = jnp.asarray(bbox, jnp.float32)
    n = preds.shape[0]

    # --- hoisted out of the kernel: keep mask + first kept bbox scalars -----
    keep = jnp.logical_not(jnp.all(bbox == 1.0, axis=1))        # (n,) bool
    count = jnp.sum(keep.astype(jnp.float32))
    first_idx = jnp.argmax(keep)                                 # first True
    fb = jax.lax.dynamic_slice_in_dim(bbox, first_idx, 1, axis=0).reshape(4)
    bx1, by1, bx2, by2 = fb[0], fb[1], fb[2], fb[3]
    bw = bx2 - bx1 + 1.0
    bh = by2 - by1 + 1.0
    area_b_eps = bw * bh + jnp.float32(eps)
    scal = jnp.stack([bx1, by1, bx2, by2, bw, bh, area_b_eps]).astype(jnp.float32)

    # --- lane/sublane-dense coordinate-major layout + tiling ----------------
    tile_r, num_tiles = _choose_tiling(n)
    r_total = num_tiles * tile_r
    n_pad = r_total * _LANES

    if n_pad != n:
        preds_p = jnp.pad(preds, ((0, n_pad - n), (0, 0)))      # fused pad+transpose
        keep_i8 = jnp.pad(keep.astype(jnp.int8), (0, n_pad - n))
    else:
        preds_p = preds
        keep_i8 = keep.astype(jnp.int8)
    preds_cm = preds_p.T.reshape(4, r_total, _LANES)             # (4, R, 128) f32
    mask_cm = keep_i8.reshape(r_total, _LANES)                   # (R, 128) int8

    kernel = functools.partial(_giou_partial_kernel, eps=float(eps))
    partials = pl.pallas_call(
        kernel,
        out_shape=jax.ShapeDtypeStruct((num_tiles, 1, _LANES), jnp.float32),
        grid=(num_tiles,),
        in_specs=[
            pl.BlockSpec(memory_space=pltpu.MemorySpace.SMEM),          # gt scalars
            pl.BlockSpec((4, tile_r, _LANES), lambda i: (0, i, 0)),      # preds
            pl.BlockSpec((tile_r, _LANES), lambda i: (i, 0)),            # keep mask
        ],
        out_specs=pl.BlockSpec((1, 1, _LANES), lambda i: (i, 0, 0)),
        compiler_params=pltpu.CompilerParams(
            dimension_semantics=("parallel",),
        ),
    )(scal, preds_cm, mask_cm)

    total = jnp.sum(partials)
    if reduction == "mean":
        total = total / count
    return total


def _reference_giou_loss(preds, bbox, eps=1e-7, reduction="mean"):
    """Pure-numpy replica of the PyTorch forward (including its dim=1 cat quirk)."""
    preds = np.asarray(preds, np.float32)
    bbox = np.asarray(bbox, np.float32)
    keep = ~np.all(bbox == 1.0, axis=1)
    preds_k = preds[keep]                 # (K, 4)
    first = bbox[keep][0]                 # only first kept bbox is used
    px1, py1, px2, py2 = preds_k[:, 0], preds_k[:, 1], preds_k[:, 2], preds_k[:, 3]
    bx1, by1, bx2, by2 = first[0], first[1], first[2], first[3]
    ix1 = np.maximum(px1, bx1); iy1 = np.maximum(py1, by1)
    ix2 = np.minimum(px2, bx2); iy2 = np.minimum(py2, by2)
    iw = np.clip(ix2 - ix1 + 1.0, 0.0, None)
    ih = np.clip(iy2 - iy1 + 1.0, 0.0, None)
    inters = iw * ih
    uni = ((px2 - px1 + 1.0) * (py2 - py1 + 1.0)
           + (bx2 - bx1 + 1.0) * (by2 - by1 + 1.0) - inters + eps)
    ious = inters / uni
    ex1 = np.minimum(px1, bx1); ey1 = np.minimum(py1, by1)
    ex2 = np.maximum(px2, bx2); ey2 = np.maximum(py2, by2)
    ew = np.clip(ex2 - ex1 + 1.0, 0.0, None)
    eh = np.clip(ey2 - ey1 + 1.0, 0.0, None)
    enclose = ew * eh + eps
    giou = ious - (enclose - uni) / enclose
    loss = 1.0 - giou
    return np.mean(loss) if reduction == "mean" else np.sum(loss)


def _make_inputs(key, n, ignore_rows):
    k1, k2, k3, k4 = jax.random.split(key, 4)
    p_xy = jax.random.uniform(k1, (n, 2), jnp.float32, 0.0, 10.0)
    p_wh = jax.random.uniform(k2, (n, 2), jnp.float32, 1.0, 8.0)
    preds = jnp.concatenate([p_xy, p_xy + p_wh], axis=1)
    b_xy = jax.random.uniform(k3, (n, 2), jnp.float32, 0.0, 10.0)
    b_wh = jax.random.uniform(k4, (n, 2), jnp.float32, 1.0, 8.0)
    bbox = jnp.concatenate([b_xy, b_xy + b_wh], axis=1)
    for r in ignore_rows:
        bbox = bbox.at[r].set(jnp.ones((4,), jnp.float32))
    return preds, bbox


if __name__ == "__main__":
    key = jax.random.PRNGKey(0)
    ka, kb = jax.random.split(key)

    # --- small case (typical module usage), single tile ---------------------
    preds_s, bbox_s = _make_inputs(ka, 8, (2, 5))
    out_mean = jax.block_until_ready(giou_loss(preds_s, bbox_s, eps=1e-7, reduction="mean"))
    out_sum = jax.block_until_ready(giou_loss(preds_s, bbox_s, eps=1e-7, reduction="sum"))
    ref_mean = _reference_giou_loss(np.asarray(preds_s), np.asarray(bbox_s),
                                    eps=1e-7, reduction="mean")
    ref_sum = _reference_giou_loss(np.asarray(preds_s), np.asarray(bbox_s),
                                   eps=1e-7, reduction="sum")
    assert np.allclose(np.asarray(out_mean), ref_mean, rtol=1e-5, atol=1e-5), (
        f"mean mismatch: kernel={np.asarray(out_mean)} ref={ref_mean}")
    assert np.allclose(np.asarray(out_sum), ref_sum, rtol=1e-5, atol=1e-5), (
        f"sum mismatch: kernel={np.asarray(out_sum)} ref={ref_sum}")

    # --- larger case: exercises padding + the 2-tile (megacore) path --------
    preds_l, bbox_l = _make_inputs(kb, 8200, (0, 7, 4096, 8199))
    out_mean_l = jax.block_until_ready(giou_loss(preds_l, bbox_l, eps=1e-7, reduction="mean"))
    ref_mean_l = _reference_giou_loss(np.asarray(preds_l), np.asarray(bbox_l),
                                      eps=1e-7, reduction="mean")
    assert np.allclose(np.asarray(out_mean_l), ref_mean_l, rtol=1e-4, atol=1e-4), (
        f"large mean mismatch: kernel={np.asarray(out_mean_l)} ref={ref_mean_l}")

    print("KERNEL_OK")
</pallas_src>

<mosaic_0001>
module attributes {stable_mosaic.version = 11 : i64} {
  func.func @_giou_partial_kernel(%arg0: i32, %arg1: memref<7xf32, #tpu.memory_space<smem>>, %arg2: memref<4x32x128xf32, #tpu.memory_space<vmem>>, %arg3: memref<32x128xi8, #tpu.memory_space<vmem>>, %arg4: memref<1x1x128xf32, #tpu.memory_space<vmem>>) attributes {dimension_semantics = [#tpu.dimension_semantics<parallel>], iteration_bounds = array<i64: 1>, scalar_prefetch = 0 : i64, scratch_operands = 0 : i64, tpu.core_type = #tpu.core_type<tc>, window_params = [{transform_indices = @transform_0, window_bounds = array<i64: 7>}, {transform_indices = @transform_1, window_bounds = array<i64: 4, 32, 128>}, {transform_indices = @transform_2, window_bounds = array<i64: 32, 128>}, {transform_indices = @transform_3, window_bounds = array<i64: 1, 1, 128>}]} {
    %c0 = arith.constant 0 : index
    %0 = memref.load %arg1[%c0] : memref<7xf32, #tpu.memory_space<smem>>
    %c1 = arith.constant 1 : index
    %1 = memref.load %arg1[%c1] : memref<7xf32, #tpu.memory_space<smem>>
    %c2 = arith.constant 2 : index
    %2 = memref.load %arg1[%c2] : memref<7xf32, #tpu.memory_space<smem>>
    %c3 = arith.constant 3 : index
    %3 = memref.load %arg1[%c3] : memref<7xf32, #tpu.memory_space<smem>>
    %c4 = arith.constant 4 : index
    %4 = memref.load %arg1[%c4] : memref<7xf32, #tpu.memory_space<smem>>
    %c5 = arith.constant 5 : index
    %5 = memref.load %arg1[%c5] : memref<7xf32, #tpu.memory_space<smem>>
    %c6 = arith.constant 6 : index
    %6 = memref.load %arg1[%c6] : memref<7xf32, #tpu.memory_space<smem>>
    %c0_0 = arith.constant 0 : index
    %c0_1 = arith.constant 0 : index
    %c0_2 = arith.constant 0 : index
    %7 = vector.load %arg2[%c0_0, %c0_1, %c0_2] : memref<4x32x128xf32, #tpu.memory_space<vmem>>, vector<1x32x128xf32>
    %8 = vector.shape_cast %7 : vector<1x32x128xf32> to vector<32x128xf32>
    %c1_3 = arith.constant 1 : index
    %c0_4 = arith.constant 0 : index
    %c0_5 = arith.constant 0 : index
    %9 = vector.load %arg2[%c1_3, %c0_4, %c0_5] : memref<4x32x128xf32, #tpu.memory_space<vmem>>, vector<1x32x128xf32>
    %10 = vector.shape_cast %9 : vector<1x32x128xf32> to vector<32x128xf32>
    %c2_6 = arith.constant 2 : index
    %c0_7 = arith.constant 0 : index
    %c0_8 = arith.constant 0 : index
    %11 = vector.load %arg2[%c2_6, %c0_7, %c0_8] : memref<4x32x128xf32, #tpu.memory_space<vmem>>, vector<1x32x128xf32>
    %12 = vector.shape_cast %11 : vector<1x32x128xf32> to vector<32x128xf32>
    %c3_9 = arith.constant 3 : index
    %c0_10 = arith.constant 0 : index
    %c0_11 = arith.constant 0 : index
    %13 = vector.load %arg2[%c3_9, %c0_10, %c0_11] : memref<4x32x128xf32, #tpu.memory_space<vmem>>, vector<1x32x128xf32>
    %14 = vector.shape_cast %13 : vector<1x32x128xf32> to vector<32x128xf32>
    %15 = vector.broadcast %2 : f32 to vector<32x128xf32>
    %16 = arith.minimumf %12, %15 : vector<32x128xf32>
    %17 = vector.broadcast %0 : f32 to vector<32x128xf32>
    %18 = arith.maximumf %8, %17 : vector<32x128xf32>
    %19 = arith.subf %16, %18 : vector<32x128xf32>
    %cst = arith.constant 1.000000e+00 : f32
    %20 = vector.broadcast %cst : f32 to vector<32x128xf32>
    %21 = arith.addf %19, %20 : vector<32x128xf32>
    %22 = vector.broadcast %3 : f32 to vector<32x128xf32>
    %23 = arith.minimumf %14, %22 : vector<32x128xf32>
    %24 = vector.broadcast %1 : f32 to vector<32x128xf32>
    %25 = arith.maximumf %10, %24 : vector<32x128xf32>
    %26 = arith.subf %23, %25 : vector<32x128xf32>
    %cst_12 = arith.constant 1.000000e+00 : f32
    %27 = vector.broadcast %cst_12 : f32 to vector<32x128xf32>
    %28 = arith.addf %26, %27 : vector<32x128xf32>
    %cst_13 = arith.constant 0.000000e+00 : f32
    %29 = vector.broadcast %cst_13 : f32 to vector<32x128xf32>
    %30 = arith.maximumf %21, %29 : vector<32x128xf32>
    %cst_14 = arith.constant 0.000000e+00 : f32
    %31 = vector.broadcast %cst_14 : f32 to vector<32x128xf32>
    %32 = arith.maximumf %28, %31 : vector<32x128xf32>
    %33 = arith.mulf %30, %32 : vector<32x128xf32>
    %34 = arith.subf %12, %8 : vector<32x128xf32>
    %cst_15 = arith.constant 1.000000e+00 : f32
    %35 = vector.broadcast %cst_15 : f32 to vector<32x128xf32>
    %36 = arith.addf %34, %35 : vector<32x128xf32>
    %37 = arith.subf %14, %10 : vector<32x128xf32>
    %cst_16 = arith.constant 1.000000e+00 : f32
    %38 = vector.broadcast %cst_16 : f32 to vector<32x128xf32>
    %39 = arith.addf %37, %38 : vector<32x128xf32>
    %40 = arith.mulf %36, %39 : vector<32x128xf32>
    %41 = arith.subf %36, %21 : vector<32x128xf32>
    %42 = vector.broadcast %4 : f32 to vector<32x128xf32>
    %43 = arith.addf %41, %42 : vector<32x128xf32>
    %cst_17 = arith.constant 0.000000e+00 : f32
    %44 = vector.broadcast %cst_17 : f32 to vector<32x128xf32>
    %45 = arith.maximumf %43, %44 : vector<32x128xf32>
    %46 = arith.subf %39, %28 : vector<32x128xf32>
    %47 = vector.broadcast %5 : f32 to vector<32x128xf32>
    %48 = arith.addf %46, %47 : vector<32x128xf32>
    %cst_18 = arith.constant 0.000000e+00 : f32
    %49 = vector.broadcast %cst_18 : f32 to vector<32x128xf32>
    %50 = arith.maximumf %48, %49 : vector<32x128xf32>
    %51 = arith.mulf %45, %50 : vector<32x128xf32>
    %cst_19 = arith.constant 1.000000e-07 : f32
    %52 = vector.broadcast %cst_19 : f32 to vector<32x128xf32>
    %53 = arith.addf %51, %52 : vector<32x128xf32>
    %54 = vector.broadcast %6 : f32 to vector<32x128xf32>
    %55 = arith.addf %40, %54 : vector<32x128xf32>
    %56 = arith.subf %55, %33 : vector<32x128xf32>
    %57 = tpu.reciprocal %56 {approx = true} : vector<32x128xf32> -> vector<32x128xf32>
    %58 = arith.mulf %56, %57 : vector<32x128xf32>
    %cst_20 = arith.constant 2.000000e+00 : f32
    %59 = vector.broadcast %cst_20 : f32 to vector<32x128xf32>
    %60 = arith.subf %59, %58 : vector<32x128xf32>
    %61 = arith.mulf %57, %60 : vector<32x128xf32>
    %62 = tpu.reciprocal %53 {approx = true} : vector<32x128xf32> -> vector<32x128xf32>
    %63 = arith.mulf %53, %62 : vector<32x128xf32>
    %cst_21 = arith.constant 2.000000e+00 : f32
    %64 = vector.broadcast %cst_21 : f32 to vector<32x128xf32>
    %65 = arith.subf %64, %63 : vector<32x128xf32>
    %66 = arith.mulf %62, %65 : vector<32x128xf32>
    %67 = arith.mulf %33, %61 : vector<32x128xf32>
    %cst_22 = arith.constant 2.000000e+00 : f32
    %68 = vector.broadcast %cst_22 : f32 to vector<32x128xf32>
    %69 = arith.subf %68, %67 : vector<32x128xf32>
    %70 = arith.mulf %56, %66 : vector<32x128xf32>
    %71 = arith.subf %69, %70 : vector<32x128xf32>
    %c0_23 = arith.constant 0 : index
    %c0_24 = arith.constant 0 : index
    %72 = vector.load %arg3[%c0_23, %c0_24] : memref<32x128xi8, #tpu.memory_space<vmem>>, vector<32x128xi8>
    %c0_i8 = arith.constant 0 : i8
    %73 = vector.broadcast %c0_i8 : i8 to vector<32x128xi8>
    %74 = arith.cmpi ne, %72, %73 : vector<32x128xi8>
    %cst_25 = arith.constant 0.000000e+00 : f32
    %75 = vector.broadcast %cst_25 : f32 to vector<32x128xf32>
    %76 = arith.select %74, %71, %75 : vector<32x128xi1>, vector<32x128xf32>
    %cst_26 = arith.constant dense<0.000000e+00> : vector<128xf32>
    %77 = vector.multi_reduction <add>, %76, %cst_26 [0] : vector<32x128xf32> to vector<128xf32>
    %78 = vector.shape_cast %77 : vector<128xf32> to vector<1x128xf32>
    %c0_27 = arith.constant 0 : index
    %c0_28 = arith.constant 0 : index
    %c0_29 = arith.constant 0 : index
    %79 = vector.load %arg4[%c0_27, %c0_28, %c0_29] : memref<1x1x128xf32, #tpu.memory_space<vmem>>, vector<1x1x128xf32>
    %80 = vector.shape_cast %79 : vector<1x1x128xf32> to vector<1x128xf32>
    %81 = vector.shape_cast %78 : vector<1x128xf32> to vector<1x1x128xf32>
    tpu.vector_store %arg4[%c0_27, %c0_28, %c0_29], %81 {strides = array<i32>} : memref<1x1x128xf32, #tpu.memory_space<vmem>>, vector<1x1x128xf32>,
    return
  }
  func.func @transform_0(%arg0: i32) -> i32 {
    %c0_i32 = arith.constant 0 : i32
    %c0_i32_0 = arith.constant 0 : i32
    return %c0_i32 : i32
  }
  func.func @transform_1(%arg0: i32) -> (i32, i32, i32) {
    %c0_i32 = arith.constant 0 : i32
    %c0_i32_0 = arith.constant 0 : i32
    %c0_i32_1 = arith.constant 0 : i32
    return %c0_i32, %arg0, %c0_i32_0 : i32, i32, i32
  }
  func.func @transform_2(%arg0: i32) -> (i32, i32) {
    %c0_i32 = arith.constant 0 : i32
    %c0_i32_0 = arith.constant 0 : i32
    return %arg0, %c0_i32 : i32, i32
  }
  func.func @transform_3(%arg0: i32) -> (i32, i32, i32) {
    %c0_i32 = arith.constant 0 : i32
    %c0_i32_0 = arith.constant 0 : i32
    %c0_i32_1 = arith.constant 0 : i32
    return %arg0, %c0_i32, %c0_i32_0 : i32, i32, i32
  }
}

</mosaic_0001>

<bundles_post_ra>
// kernel: tpu_custom_call.1
= control target key start
LH: loop header
LB: loop body
LE: loop exit
PB: predicated region body
PF: predicated region fallthrough
CT: control target
= control target key end

     0   :  { %8 = vsyncpa [#allocation5], 0  ;;  %s524_s0 = inlined_call_operand.hbm [shape: f32[7], index: 0, kind: input, shape index: {}]   ;;  %s525_s1 = inlined_call_operand.hbm [shape: f32[4,32,128], index: 1, kind: input, shape index: {}]   ;;  %s526_s2 = inlined_call_operand.hbm [shape: s8[32,128], index: 2, kind: input, shape index: {}]   ;;  %s527_s3 = inlined_call_operand.hbm [shape: f32[1,1,128], index: 3, kind: output, shape index: {}]  }
   0x1   :  { %9 = vsyncpa [#allocation3], 0 }
   0x2   :  { %10 = vsyncpa [#allocation8], 0 }
   0x3   :  { %11 = vsyncpa [#allocation4], 0  ;;  %s406_s12 = smov [#allocation2]   ;;  %s407_s15 = smov [#allocation6]  }
   0x4   :  { %19 = dma.hbm_to_smem %s524_s0, 16, %s406_s12, [#allocation5]  }
   0x5   :  { %s25_s16 = sshll.u32 %s407_s15, 4  ;;  %s26_s16 = int_to_ptr.vmem [resolvable:$true] %s25_s16 }
   0x6   :  { %s346_s17 = scalar_lea.vmem %s26_s16, 2048  ;;  %p351_p1 = scmp.lt.s32.totalorder %s26_s16, %s26_s16 }
   0x7   :  { %p347_p0 = scmp.ne.s32.totalorder %s26_s16, %s346_s17  ;;  %p352_p2 = scmp.lt.s32.totalorder %s346_s17, %s346_s17 }
   0x9   :  { %p353_p3 = por %p352_p2, %p351_p1 }
   0xb   :  { %p354_p4 = pnand %p353_p3, %p347_p0 }
   0xd   :  { %357 = shalt.err (!%p354_p4)
}
   0xe   :  { %s408_s18 = smov 128   ;;  %s409_s19 = smov 8  }
   0xf   :  { %31 = dma.hbm_to_vmem [thread:$0]  %s525_s1, 2048, %s26_s16, [#allocation3], %s408_s18, %s408_s18, %s409_s19  }
  0x10   :  { %s410_s22 = smov [#allocation7]  }
  0x11   :  { %s38_s23 = sshll.u32 %s410_s22, 4  ;;  %s39_s23 = int_to_ptr.vmem [resolvable:$true] %s38_s23 }
  0x12   :  { %s366_s0 = scalar_lea.vmem %s39_s23, 128  ;;  %p371_p6 = scmp.lt.s32.totalorder %s39_s23, %s39_s23 }
  0x13   :  { %p367_p5 = scmp.ne.s32.totalorder %s39_s23, %s366_s0  ;;  %p372_p7 = scmp.lt.s32.totalorder %s366_s0, %s366_s0 }
  0x15   :  { %p373_p8 = por %p372_p7, %p371_p6 }
  0x17   :  { %p374_p9 = pnand %p373_p8, %p367_p5 }
  0x19   :  { %377 = shalt.err (!%p374_p9)
}
  0x1a   :  { %41 = dma.hbm_to_vmem [thread:$0]  %s526_s2, 128, %s39_s23, [#allocation8]  }
  0x1b   :  { %398 = dma.done.wait [#allocation5], 16  }
  0x1c   :  { %399 = vsyncadd [#allocation5], 4294967280 }
  0x1d   :  { %400 = dma.done.wait [#allocation3], 2048  }
  0x1e   :  { %401 = vsyncadd [#allocation3], 4294965248 }
  0x1f   :  { %402 = dma.done.wait [#allocation8], 128  }
  0x20   :  { %403 = vsyncadd [#allocation8], 4294967168 }
  0x21   :  { %51 = sfence }
  0x22   :  { %s54_s1 = sld [smem:[#allocation2]]  ;;  %v61_v0 = vld [vmem:[#allocation6] sm:$0xff]  ;;  %v62_v1 = vld [vmem:[#allocation6 + $0x8] sm:$0xff]  ;;  %v63_v2 = vld [vmem:[#allocation6 + $0x10] sm:$0xff]  ;;  %s412_s4 = smov [#allocation9]  }
  0x23   :  { %s442_s26 = sld [smem:[#allocation2 + $0x1]]  ;;  %v64_v3 = vld [vmem:[#allocation6 + $0x18] sm:$0xff]  ;;  %v66_v4 = vld [vmem:[#allocation6 + $0x20] sm:$0xff]  ;;  %v444_v5 = vld [vmem:[#allocation6 + $0x28] sm:$0xff]  ;;  %s290_s5 = sshll.u32 %s412_s4, 4  ;;  %s291_s5 = int_to_ptr.vmem [resolvable:$true] %s290_s5 }
  0x24   :  { %s302_s27 = sld [smem:[#allocation2 + $0x2]]  ;;  %v446_v6 = vld [vmem:[#allocation6 + $0x30] sm:$0xff]  ;;  %v71_v7 = vld [vmem:[#allocation6 + $0x40] sm:$0xff]  ;;  %v72_v8 = vld [vmem:[#allocation6 + $0x48] sm:$0xff]  ;;  %s378_s6 = scalar_lea.vmem %s291_s5, 16 }
  0x25   :  { %s448_s2 = sld [smem:[#allocation2 + $0x3]]  ;;  %v73_v9 = vld [vmem:[#allocation6 + $0x50] sm:$0xff]  ;;  %v74_v10 = vld [vmem:[#allocation6 + $0x58] sm:$0xff]  ;;  %v128_v11 = vsub.f32 %v71_v7, %v61_v0  ;;  %v76_v12 = vld [vmem:[#allocation6 + $0x60] sm:$0xff]  ;;  %v129_v15 = vsub.f32 %v72_v8, %v62_v1  ;;  %p379_p10 = scmp.ne.s32.totalorder %s291_s5, %s378_s6 }
  0x26   :  { %v77_v13 = vld [vmem:[#allocation6 + $0x68] sm:$0xff]  ;;  %v78_v14 = vld [vmem:[#allocation6 + $0x70] sm:$0xff]  ;;  %v130_v16 = vsub.f32 %v73_v9, %v63_v2  ;;  %v131_v17 = vsub.f32 %v74_v10, %v64_v3  ;;  %v136_v19 = vsub.f32 %v76_v12, %v66_v4  ;;  %v69_v26 = vld [vmem:[#allocation6 + $0x38] sm:$0xff]  ;;  %s466_s28 = sld [smem:[#allocation2 + $0x4]]  ;;  %s382_s7 = scalar_lea.vmem %s291_s5, 32 }
  0x27   :  { %v450_v18 = vadd.f32 1.0, %v128_v11  ;;  %v137_v20 = vsub.f32 %v77_v13, %v444_v5  ;;  %v138_v21 = vsub.f32 %v78_v14, %v446_v6  ;;  %v454_v23 = vadd.f32 1.0, %v129_v15  ;;  %v79_v27 = vld [vmem:[#allocation6 + $0x78] sm:$0xff]  ;;  %s468_s29 = sld [smem:[#allocation2 + $0x5]]  ;;  %p383_p11 = scmp.lt.s32.totalorder %s291_s5, %s291_s5 }
  0x28   :  { %v85_v22 = vstv %s54_s1  ;;  %v456_v24 = vadd.f32 1.0, %v130_v16  ;;  %v458_v25 = vadd.f32 1.0, %v131_v17  ;;  %v139_v34 = vsub.f32 %v79_v27, %v69_v26  ;;  %s470_s30 = sld [smem:[#allocation2 + $0x6]]  ;;  %p384_p12 = scmp.lt.s32.totalorder %s382_s7, %s378_s6 }
  0x29   :  { %v86_v28 = vmax.f32 %v61_v0, %v85_v22  ;;  %v87_v29 = vmax.f32 %v62_v1, %v85_v22  ;;  %v88_v30 = vmax.f32 %v63_v2, %v85_v22  ;;  %v89_v31 = vmax.f32 %v64_v3, %v85_v22 }
  0x2a   :  { %v80_v32 = vstv %s302_s27  ;;  %v103_v33 = vstv %s442_s26  ;;  %v461_v35 = vadd.f32 1.0, %v136_v19  ;;  %p385_p13 = por %p384_p12, %p383_p11 }
  0x2b   :  { %v81_v36 = vmin.f32 %v71_v7, %v80_v32  ;;  %v82_v37 = vmin.f32 %v72_v8, %v80_v32  ;;  %v83_v38 = vmin.f32 %v73_v9, %v80_v32  ;;  %v84_v39 = vmin.f32 %v74_v10, %v80_v32 }
  0x2c   :  { %v98_v40 = vstv %s448_s2  ;;  %v104_v41 = vmax.f32 %v66_v4, %v103_v33  ;;  %v105_v42 = vmax.f32 %v444_v5, %v103_v33  ;;  %v106_v43 = vmax.f32 %v446_v6, %v103_v33  ;;  %p386_p0 = pnand %p385_p13, %p379_p10 }
  0x2d   :  { %v90_v44 = vsub.f32 %v81_v36, %v86_v28  ;;  %v91_v45 = vsub.f32 %v82_v37, %v87_v29  ;;  %v92_v46 = vsub.f32 %v83_v38, %v88_v30  ;;  %v93_v47 = vsub.f32 %v84_v39, %v89_v31 }
  0x2e   :  { %v99_v48 = vmin.f32 %v76_v12, %v98_v40  ;;  %v100_v49 = vmin.f32 %v77_v13, %v98_v40  ;;  %v101_v50 = vmin.f32 %v78_v14, %v98_v40  ;;  %v102_v51 = vmin.f32 %v79_v27, %v98_v40 }
  0x2f   :  { %v94_v52 = vadd.f32 1.0, %v90_v44  ;;  %v95_v53 = vadd.f32 1.0, %v91_v45  ;;  %v96_v54 = vadd.f32 1.0, %v92_v46  ;;  %v97_v55 = vadd.f32 1.0, %v93_v47 }
  0x30   :  { %v107_v56 = vmax.f32 %v69_v26, %v103_v33  ;;  %v108_v57 = vsub.f32 %v99_v48, %v104_v41  ;;  %v109_v58 = vsub.f32 %v100_v49, %v105_v42  ;;  %v110_v59 = vsub.f32 %v101_v50, %v106_v43 }
  0x31   :  { %v116_v60 = vmax.f32 %v94_v52, 0.0  ;;  %v117_v61 = vmax.f32 %v95_v53, 0.0  ;;  %v118_v62 = vmax.f32 %v96_v54, 0.0  ;;  %v119_v63 = vmax.f32 %v97_v55, 0.0 }
  0x32   :  { %v111_v0 = vsub.f32 %v102_v51, %v107_v56  ;;  %v112_v1 = vadd.f32 1.0, %v108_v57  ;;  %v113_v2 = vadd.f32 1.0, %v109_v58  ;;  %v114_v3 = vadd.f32 1.0, %v110_v59 }
  0x33   :  { %v141_v4 = vadd.f32 1.0, %v137_v20  ;;  %v142_v5 = vadd.f32 1.0, %v138_v21  ;;  %v143_v6 = vadd.f32 1.0, %v139_v34  ;;  %v144_v7 = vmul.f32 %v461_v35, %v450_v18 }
  0x34   :  { %v115_v8 = vadd.f32 1.0, %v111_v0  ;;  %v120_v9 = vmax.f32 %v112_v1, 0.0  ;;  %v121_v10 = vmax.f32 %v113_v2, 0.0  ;;  %v122_v11 = vmax.f32 %v114_v3, 0.0 }
  0x35   :  { %v145_v12 = vmul.f32 %v141_v4, %v454_v23  ;;  %v146_v13 = vmul.f32 %v142_v5, %v456_v24  ;;  %v147_v14 = vmul.f32 %v143_v6, %v458_v25  ;;  %v148_v15 = vsub.f32 %v450_v18, %v94_v52  ;;  %v239_v52 = vld [vmem:[#allocation7] sm:$0xff] }
  0x36   :  { %v123_v16 = vmax.f32 %v115_v8, 0.0  ;;  %v478_v17 = vmul.f32 %v120_v9, %v116_v60  ;;  %v480_v19 = vmul.f32 %v121_v10, %v117_v61  ;;  %v482_v20 = vmul.f32 %v122_v11, %v118_v62 }
  0x37   :  { %v149_v21 = vsub.f32 %v454_v23, %v95_v53  ;;  %v150_v22 = vsub.f32 %v456_v24, %v96_v54  ;;  %v151_v26 = vsub.f32 %v458_v25, %v97_v55  ;;  %v152_v27 = vstv %s466_s28 }
  0x38   :  { %v488_v28 = vmul.f32 %v123_v16, %v119_v63  ;;  %v153_v29 = vadd.f32 %v152_v27, %v148_v15  ;;  %v161_v18 = vsub.f32 %v461_v35, %v112_v1  ;;  %v162_v30 = vsub.f32 %v141_v4, %v113_v2 }
  0x39   :  { %v154_v31 = vadd.f32 %v152_v27, %v149_v21  ;;  %v155_v32 = vadd.f32 %v152_v27, %v150_v22  ;;  %v156_v33 = vadd.f32 %v152_v27, %v151_v26  ;;  %v163_v34 = vsub.f32 %v142_v5, %v114_v3 }
  0x3a   :  { %v157_v36 = vmax.f32 %v153_v29, 0.0  ;;  %v164_v37 = vsub.f32 %v143_v6, %v115_v8  ;;  %v165_v38 = vstv %s468_s29  ;;  %v182_v39 = vstv %s470_s30 }
  0x3b   :  { %v158_v23 = vmax.f32 %v154_v31, 0.0  ;;  %v159_v40 = vmax.f32 %v155_v32, 0.0  ;;  %v160_v24 = vmax.f32 %v156_v33, 0.0  ;;  %v166_v41 = vadd.f32 %v165_v38, %v161_v18 }
  0x3c   :  { %v167_v25 = vadd.f32 %v165_v38, %v162_v30  ;;  %v168_v42 = vadd.f32 %v165_v38, %v163_v34  ;;  %v169_v43 = vadd.f32 %v165_v38, %v164_v37  ;;  %v183_v44 = vadd.f32 %v182_v39, %v144_v7 }
  0x3d   :  { %v170_v45 = vmax.f32 %v166_v41, 0.0  ;;  %v184_v46 = vadd.f32 %v182_v39, %v145_v12  ;;  %v185_v35 = vadd.f32 %v182_v39, %v146_v13  ;;  %v186_v47 = vadd.f32 %v182_v39, %v147_v14 }
  0x3e   :  { %v171_v48 = vmax.f32 %v167_v25, 0.0  ;;  %v172_v49 = vmax.f32 %v168_v42, 0.0  ;;  %v173_v50 = vmax.f32 %v169_v43, 0.0  ;;  %v494_v51 = vsub.f32 %v183_v44, %v478_v17 }
  0x3f   :  { %v174_v53 = vmul.f32 %v170_v45, %v157_v36  ;;  %v497_v54 = vsub.f32 %v184_v46, %v480_v19  ;;  %v500_v55 = vsub.f32 %v185_v35, %v482_v20  ;;  %v503_v56 = vsub.f32 %v186_v47, %v488_v28 }
  0x40   :  { %v175_v57 = vmul.f32 %v171_v48, %v158_v23  ;;  %v176_v58 = vmul.f32 %v172_v49, %v159_v40  ;;  %v177_v59 = vmul.f32 %v173_v50, %v160_v24  ;;  %314 = vrcp.f32 %v494_v51 }
  0x41   :  { %v178_v60 = vadd.f32 1e-07, %v174_v53  ;;  %316 = vrcp.f32 %v497_v54  ;;  %vm240_vm0 = vnez %v239_v52  ;;  %v411_v0 = vmov 0  }
  0x42   :  { %v179_v61 = vadd.f32 1e-07, %v175_v57  ;;  %v180_v62 = vadd.f32 1e-07, %v176_v58  ;;  %318 = vrcp.f32 %v500_v55  ;;  %v181_v63 = vadd.f32 1e-07, %v177_v59 }
  0x43   :  { %320 = vrcp.f32 %v503_v56  ;;  %v241_v1 = vsel %vm240_vm0, 16843009, %v411_v0 }
  0x44   :  { %322 = vrcp.f32 %v178_v60  ;;  %v242_v2 = vunpack.c.0.s8 %v241_v1  ;;  %v243_v3 = vunpack.c.1.s8 %v241_v1  ;;  %v244_v4 = vunpack.c.2.s8 %v241_v1 }
  0x45   :  { %324 = vrcp.f32 %v179_v61  ;;  %v245_v5 = vunpack.c.3.s8 %v241_v1 }
  0x46   :  { %326 = vrcp.f32 %v180_v62  ;;  %v246_v6 = vpack.c.b16 %v242_v2, %v242_v2  ;;  %v248_v7 = vpack.c.b16 %v243_v3, %v243_v3  ;;  %v250_v8 = vpack.c.b16 %v244_v4, %v244_v4 }
  0x47   :  { %328 = vrcp.f32 %v181_v63  ;;  %v252_v9 = vpack.c.b16 %v245_v5, %v245_v5 }
  0x48   :  { %v247_v10 = vpack.c.b8 %v246_v6, %v246_v6  ;;  %v249_v11 = vpack.c.b8 %v248_v7, %v248_v7  ;;  %v251_v12 = vpack.c.b8 %v250_v8, %v250_v8 }
  0x49   :  { %v253_v13 = vpack.c.b8 %v252_v9, %v252_v9 }
  0x4a   :  { %vm254_vm1 = vnez %v247_v10  ;;  %vm255_vm2 = vnez %v249_v11  ;;  %vm256_vm3 = vnez %v251_v12 }
  0x4b   :  { %vm257_vm4 = vnez %v253_v13  ;;  %v258_v21 = vsel %vm254_vm1, 16843009, %v411_v0  ;;  %v259_v27 = vsel %vm255_vm2, 16843009, %v411_v0  ;;  %v260_v31 = vsel %vm256_vm3, 16843009, %v411_v0 }
  0x4c   :  { %v261_v36 = vsel %vm257_vm4, 16843009, %v411_v0  ;;  %v262_v37 = vunpack.c.0.s8 %v258_v21  ;;  %v263_v24 = vunpack.c.0.s8 %v259_v27  ;;  %v264_v44 = vunpack.c.0.s8 %v260_v31 }
  0x4d   :  { %v315_v14 = vpop.eup %314 }
  0x4e   :  { %v317_v15 = vpop.eup %316  ;;  %v195_v16 = vmul.f32 %v315_v14, %v494_v51  ;;  %vm266_vm5 = vcmp.ne.s32.totalorder %v262_v37, 0  ;;  %vm267_vm6 = vcmp.ne.s32.totalorder %v263_v24, 0  ;;  %vm268_vm7 = vcmp.ne.s32.totalorder %v264_v44, 0 }
  0x4f   :  { %v319_v22 = vpop.eup %318  ;;  %v196_v26 = vmul.f32 %v317_v15, %v497_v54 }
  0x50   :  { %v321_v29 = vpop.eup %320  ;;  %v197_v18 = vmul.f32 %v319_v22, %v500_v55  ;;  %v199_v30 = vsub.f32 2.0, %v195_v16 }
  0x51   :  { %v323_v32 = vpop.eup %322  ;;  %v198_v33 = vmul.f32 %v321_v29, %v503_v56  ;;  %v200_v34 = vsub.f32 2.0, %v196_v26 }
  0x52   :  { %v325_v38 = vpop.eup %324  ;;  %v201_v39 = vsub.f32 2.0, %v197_v18  ;;  %v203_v23 = vmul.f32 %v315_v14, %v199_v30  ;;  %v211_v40 = vmul.f32 %v323_v32, %v178_v60 }
  0x53   :  { %v327_v41 = vpop.eup %326  ;;  %v202_v25 = vsub.f32 2.0, %v198_v33  ;;  %v204_v42 = vmul.f32 %v317_v15, %v200_v34  ;;  %v212_v43 = vmul.f32 %v325_v38, %v179_v61 }
  0x54   :  { %v329_v45 = vpop.eup %328  ;;  %v205_v46 = vmul.f32 %v319_v22, %v201_v39  ;;  %v213_v35 = vmul.f32 %v327_v41, %v180_v62  ;;  %v215_v47 = vsub.f32 2.0, %v211_v40  ;;  %v223_v48 = vmul.f32 %v203_v23, %v478_v17 }
  0x55   :  { %v206_v49 = vmul.f32 %v321_v29, %v202_v25  ;;  %v214_v50 = vmul.f32 %v329_v45, %v181_v63  ;;  %v216_v52 = vsub.f32 2.0, %v212_v43  ;;  %v224_v53 = vmul.f32 %v204_v42, %v480_v19 }
  0x56   :  { %v217_v57 = vsub.f32 2.0, %v213_v35  ;;  %v219_v58 = vmul.f32 %v323_v32, %v215_v47  ;;  %v225_v59 = vmul.f32 %v205_v46, %v482_v20  ;;  %v227_v60 = vsub.f32 2.0, %v223_v48 }
  0x57   :  { %v218_v0 = vsub.f32 2.0, %v214_v50  ;;  %v220_v1 = vmul.f32 %v325_v38, %v216_v52  ;;  %v226_v61 = vmul.f32 %v206_v49, %v488_v28  ;;  %v228_v2 = vsub.f32 2.0, %v224_v53 }
  0x58   :  { %v221_v3 = vmul.f32 %v327_v41, %v217_v57  ;;  %v229_v62 = vsub.f32 2.0, %v225_v59  ;;  %v231_v4 = vmul.f32 %v219_v58, %v494_v51  ;;  %v265_v17 = vunpack.c.0.s8 %v261_v36 }
  0x59   :  { %v222_v5 = vmul.f32 %v329_v45, %v218_v0  ;;  %v230_v63 = vsub.f32 2.0, %v226_v61  ;;  %v232_v6 = vmul.f32 %v220_v1, %v497_v54 }
  0x5a   :  { %v233_v19 = vmul.f32 %v221_v3, %v500_v55  ;;  %v235_v7 = vsub.f32 %v227_v60, %v231_v4  ;;  %vm269_vm8 = vcmp.ne.s32.totalorder %v265_v17, 0 }
  0x5b   :  { %v234_v20 = vmul.f32 %v222_v5, %v503_v56  ;;  %v236_v8 = vsub.f32 %v228_v2, %v232_v6 }
  0x5c   :  { %v237_v28 = vsub.f32 %v229_v62, %v233_v19  ;;  %v270_v9 = vsel %vm266_vm5, %v235_v7, 0.0 }
  0x5d   :  { %v238_v10 = vsub.f32 %v230_v63, %v234_v20  ;;  %v271_v11 = vsel %vm267_vm6, %v236_v8, 0.0 }
  0x5e   :  { %v272_v51 = vsel %vm268_vm7, %v237_v28, 0.0  ;;  %v274_v12 = vadd.f32 %v271_v11, %v270_v9 }
  0x5f   :  { %v273_v13 = vsel %vm269_vm8, %v238_v10, 0.0 }
  0x60   :  { %v275_v14 = vadd.f32 %v274_v12, %v272_v51 }
  0x62   :  { %v276_v15 = vadd.f32 %v275_v14, %v273_v13 }
  0x64   :  { %v277_v54 = vrot.slane %v276_v15, 4 }
  0x66   :  { %v278_v16 = vadd.f32 %v277_v54, %v276_v15 }
  0x68   :  { %v279_v21 = vrot.slane %v278_v16, 2 }
  0x6a   :  { %v280_v55 = vadd.f32 %v279_v21, %v278_v16 }
  0x6c   :  { %v281_v22 = vrot.slane %v280_v55, 1 }
  0x6e   :  { %v282_v56 = vadd.f32 %v281_v22, %v280_v55 }
  0x70   :  { %283 = vst [vmem:[#allocation9] sm:$0x1] %v282_v56 }
  0x71   :  { %389 = shalt.err (!%p386_p0)
}
  0x72   :  { %293 = dma.vmem_to_hbm [thread:$0]  %s291_s5, 16, %s527_s3, [#allocation4]  }
  0x73   :  { %404 = dma.done.wait [#allocation4], 16  }
  0x74   :  { %405 = vsyncadd [#allocation4], 4294967280 }
  0x75   :  { %297 = vsyncpa [#allocation3], 1 }
  0x76   :  { %298 = vsyncpa [#allocation8], 1 }
  0x77   :  { %299 = vsyncpa [#allocation4], 1 }
  0x78   :  { %300 = vsyncpa [#allocation5], 1 }

</bundles_post_ra>
